<compile_context>
chip_gen: v5e
topology: v5e:2x2
jax: 0.10.0
libtpu: 0.0.40
codegen_flags: <defaults>
</compile_context>

<pallas_src>
import functools
from typing import NamedTuple, Tuple

import jax
import jax.numpy as jnp
from jax.experimental import pallas as pl
from jax.experimental.pallas import tpu as pltpu

_LANE = 128
_SUBLANE = 8
_MIB = 1024 * 1024


# --------------------------------------------------------------------------- #
# Small helpers
# --------------------------------------------------------------------------- #
def _round_up(x: int, m: int) -> int:
    return ((x + m - 1) // m) * m


def _cdiv(a: int, b: int) -> int:
    return -(-a // b)


def _pad2d(a, rows: int, cols: int):
    r, c = a.shape
    if r == rows and c == cols:
        return a
    return jnp.pad(a, ((0, rows - r), (0, cols - c)))


def _tpu_generation() -> Tuple[int, int, bool]:
    """Heuristic (vmem_bytes_per_core, num_tensorcores, bf16_elementwise_ok)."""
    kind = ""
    try:
        kind = jax.devices()[0].device_kind.lower()
    except Exception:
        pass
    vmem_bytes = 128 * _MIB
    try:  # trace-time hardware query; tolerate absence on older jax / CPU
        info = pltpu.get_tpu_info()
        cap = getattr(info, "vmem_capacity_bytes", None)
        if cap:
            vmem_bytes = int(cap)
    except Exception:
        pass
    num_tc = 1
    bf16_elementwise = True
    if "v7" in kind:
        num_tc = 2
        vmem_bytes = min(vmem_bytes, 64 * _MIB)  # 64 MiB per TensorCore on v7x
    elif ("v5e" in kind) or ("v5 lite" in kind) or ("v5lite" in kind):
        bf16_elementwise = False                 # v5e: no bf16 VPU/EUP path
    return vmem_bytes, num_tc, bf16_elementwise


# --------------------------------------------------------------------------- #
# One-time parameter preparation (hoisted out of the per-call wrapper)
# --------------------------------------------------------------------------- #
class PreparedMLP(NamedTuple):
    weights: Tuple[jax.Array, ...]   # bf16, padded (K_pad, N_pad), pre-transposed
    biases: Tuple[jax.Array, ...]    # padded (1, N_pad); bf16 for hidden layers on
                                     # v6e/v7x, f32 otherwise (and always f32 last)
    dims: Tuple[int, ...]            # true feature dims along the chain
    pad_dims: Tuple[int, ...]        # lane-dense (multiple-of-128) padded dims
    bf16_epilogue: bool


def prepare_mlp_params(params, *, bf16_epilogue: bool | None = None) -> PreparedMLP:
    """Pad to lane-dense shapes and cast to MXU dtypes ONCE."""
    if bf16_epilogue is None:
        _, _, bf16_epilogue = _tpu_generation()
    n_layers = len(params)
    assert n_layers >= 1
    dims = [params[0][0].shape[0]] + [w.shape[1] for (w, _) in params]
    for li, (w, _) in enumerate(params):
        assert w.shape[0] == dims[li]
    pad_dims = [_round_up(d, _LANE) for d in dims]

    ws, bs = [], []
    for li, (w_t, b) in enumerate(params):
        kp, np_ = pad_dims[li], pad_dims[li + 1]
        ws.append(_pad2d(jnp.asarray(w_t, jnp.float32), kp, np_).astype(jnp.bfloat16))
        b2 = _pad2d(jnp.asarray(b, jnp.float32).reshape(1, -1), 1, np_)
        hidden = li < n_layers - 1
        bs.append(b2.astype(jnp.bfloat16) if (bf16_epilogue and hidden) else b2)
    return PreparedMLP(tuple(ws), tuple(bs), tuple(dims), tuple(pad_dims),
                       bool(bf16_epilogue))


# --------------------------------------------------------------------------- #
# Fused kernel: whole MLP on one (tm, N_pad) output tile
# --------------------------------------------------------------------------- #
def _mlp_fused_kernel(*refs, n_layers: int, bf16_epilogue: bool):
    """refs = (x_ref, w0_ref, b0_ref, ..., w_{L-1}_ref, b_{L-1}_ref, o_ref).

    Weights bf16, matmuls accumulate in f32; intermediate activations never
    touch HBM. Bias-add + tanh run in bf16 on v6e/v7x, f32 on v5e.
    """
    x_ref = refs[0]
    o_ref = refs[1 + 2 * n_layers]

    h = x_ref[...]  # bf16 (tm, K0_pad)
    for i in range(n_layers):
        w_ref = refs[1 + 2 * i]
        b_ref = refs[2 + 2 * i]
        y = jnp.dot(h, w_ref[...], preferred_element_type=jnp.float32)
        if i < n_layers - 1:
            if bf16_epilogue:
                # bf16 VALU add + bf16 EUP tanh (v6e/v7x); bias pre-cast to bf16.
                h = jnp.tanh(y.astype(jnp.bfloat16) + b_ref[...])
            else:
                # v5e: keep elementwise math in f32, feed MXU in bf16.
                h = jnp.tanh(y + b_ref[...]).astype(jnp.bfloat16)
        else:
            o_ref[...] = (y + b_ref[...]).astype(o_ref.dtype)


# --------------------------------------------------------------------------- #
# Tiling / VMEM budgeting
# --------------------------------------------------------------------------- #
def _resident_param_bytes(prep: PreparedMLP) -> int:
    total = 0
    for w, b in zip(prep.weights, prep.biases):
        total += w.size * w.dtype.itemsize + b.size * b.dtype.itemsize
    return int(total)


def _step_bytes(tm: int, pad_dims, out_itemsize: int) -> int:
    """Per-grid-step working set beyond the resident params."""
    x_bytes = 2 * tm * pad_dims[0] * 2              # double-buffered bf16 x tile
    o_bytes = 2 * tm * pad_dims[-1] * out_itemsize  # double-buffered out tile
    widest = max(pad_dims)
    inter = tm * widest * (4 + 2)                   # f32 matmul result + bf16 h
    return int(x_bytes + o_bytes + inter)


def _choose_tile_and_grid(m: int, prep: PreparedMLP, out_itemsize: int,
                          vmem_bytes: int, num_tc: int,
                          tm_override: int | None = None) -> Tuple[int, int]:
    pad_dims = prep.pad_dims
    m8 = _round_up(max(m, 1), _SUBLANE)
    resident = _resident_param_bytes(prep)
    budget = int(vmem_bytes * 0.8)  # ~20% headroom vs the physical/scoped budget

    if tm_override is not None:
        tm = max(_SUBLANE, (int(tm_override) // _SUBLANE) * _SUBLANE)
    else:
        candidates = [c for c in (512, 384, 256, 192, 128, 64, 32, 16, 8)
                      if c <= max(m8, _SUBLANE)]
        tm = candidates[-1]
        for c in candidates:
            if resident + _step_bytes(c, pad_dims, out_itemsize) <= budget:
                tm = c
                break

    # On multi-TensorCore chips (v7x) make sure the "parallel" batch grid has at
    # least num_tc steps so no core idles.  On 1-TC chips keep one big tile.
    if num_tc >= 2 and m8 > _SUBLANE:
        tm = min(tm, _round_up(_cdiv(m8, num_tc), _SUBLANE))

    # Balance tiles to minimize zero-padding waste (e.g. batch 520 with tm=512
    # would otherwise pad to 1024 rows).
    n_tiles = _cdiv(m8, tm)
    tm = _round_up(_cdiv(m8, n_tiles), _SUBLANE)
    n_tiles = _cdiv(m8, tm)

    # Even number of tiles on multi-TC chips so no core sits idle on the tail.
    if num_tc >= 2 and n_tiles > 1 and n_tiles % num_tc != 0:
        n_tiles = _round_up(n_tiles, num_tc)

    m_pad = n_tiles * tm
    return tm, m_pad


def _vmem_limit_bytes(resident_bytes: int, tm: int, pad_dims, out_itemsize: int,
                      vmem_bytes: int) -> int:
    working = resident_bytes + _step_bytes(tm, pad_dims, out_itemsize)
    limit = max(int(working * 1.25) + 4 * _MIB, 32 * _MIB)
    limit = min(limit, int(vmem_bytes) - 4 * _MIB)
    return max(limit, 16 * _MIB)


# --------------------------------------------------------------------------- #
# Pure-JAX path (tiny-MLP escape hatch; same bf16-weight precision contract)
# --------------------------------------------------------------------------- #
def _mlp_reference_prepared(x, prep: PreparedMLP):
    h = x.astype(jnp.float32)
    n = len(prep.weights)
    for i in range(n):
        w = prep.weights[i][:prep.dims[i], :prep.dims[i + 1]].astype(jnp.float32)
        b = prep.biases[i][:, :prep.dims[i + 1]].astype(jnp.float32)
        h = h @ w + b
        if i < n - 1:
            h = jnp.tanh(h)
    return h.astype(x.dtype)


# --------------------------------------------------------------------------- #
# Forward wrapper
# --------------------------------------------------------------------------- #
def mlp_forward_pallas(x, params, *, tm: int | None = None,
                       force_pallas: bool = False):
    """Fused MLP forward.

    x      : (M, K0) float32
    params : PreparedMLP (preferred, prepared once) or a raw list of
             (w_t, b) with w_t (in_features, out_features), b (1, out_features).
    """
    prep = params if isinstance(params, PreparedMLP) else prepare_mlp_params(params)
    M, K0 = x.shape
    assert K0 == prep.dims[0], (K0, prep.dims[0])
    n_layers = len(prep.weights)

    vmem_bytes, num_tc, _ = _tpu_generation()

    # Tiny-MLP escape hatch: at these sizes the kernel is pure launch/DMA
    # overhead and 128-lane padding inflates HBM traffic; let XLA fuse it.
    if not force_pallas and max(prep.dims) <= 128 and M <= 32:
        return _mlp_reference_prepared(x, prep)

    out_itemsize = jnp.dtype(x.dtype).itemsize
    tm, m_pad = _choose_tile_and_grid(M, prep, out_itemsize, vmem_bytes, num_tc,
                                      tm_override=tm)

    # Pad + cast the activations (zero rows/cols are mathematically inert:
    # padded bias columns are zero, tanh(0)=0, matching next-layer rows are zero).
    x_p = _pad2d(x.astype(jnp.float32), m_pad, prep.pad_dims[0]).astype(jnp.bfloat16)

    resident = _resident_param_bytes(prep)
    kernel = functools.partial(_mlp_fused_kernel, n_layers=n_layers,
                               bf16_epilogue=prep.bf16_epilogue)

    def _call(single_buffer_params: bool):
        def const_spec(shape):
            # Grid-invariant block: never re-DMA'd, so a single VMEM buffer is
            # enough (halves the resident weight footprint).
            if single_buffer_params:
                return pl.BlockSpec(shape, lambda i: (0, 0),
                                    pipeline_mode=pl.Buffered(1))
            return pl.BlockSpec(shape, lambda i: (0, 0))

        ins = [x_p]
        in_specs = [pl.BlockSpec((tm, prep.pad_dims[0]), lambda i: (i, 0))]
        for li in range(n_layers):
            kp, np_ = prep.pad_dims[li], prep.pad_dims[li + 1]
            ins += [prep.weights[li], prep.biases[li]]
            in_specs += [const_spec((kp, np_)), const_spec((1, np_))]

        res = resident if single_buffer_params else 2 * resident
        vmem_limit = _vmem_limit_bytes(res, tm, prep.pad_dims, out_itemsize,
                                       vmem_bytes)

        return pl.pallas_call(
            kernel,
            out_shape=jax.ShapeDtypeStruct((m_pad, prep.pad_dims[-1]), x.dtype),
            grid_spec=pltpu.PrefetchScalarGridSpec(
                num_scalar_prefetch=0,
                grid=(m_pad // tm,),
                in_specs=in_specs,
                out_specs=pl.BlockSpec((tm, prep.pad_dims[-1]), lambda i: (i, 0)),
            ),
            compiler_params=pltpu.CompilerParams(
                dimension_semantics=("parallel",),
                vmem_limit_bytes=int(vmem_limit),
            ),
        )(*ins)

    try:
        out_p = _call(True)
    except Exception:
        # Older JAX without pipeline_mode / Buffered(1): default double buffering.
        out_p = _call(False)

    return out_p[:M, :prep.dims[-1]]


# --------------------------------------------------------------------------- #
# PyTorch-style init (deterministic)
# --------------------------------------------------------------------------- #
def init_mlp_params(key, sizes, bias=True):
    """U(-1/sqrt(fan_in), 1/sqrt(fan_in)), weights stored transposed (in, out)."""
    params = []
    for i in range(len(sizes) - 1):
        fan_in, fan_out = sizes[i], sizes[i + 1]
        key, kw, kb = jax.random.split(key, 3)
        bound = 1.0 / jnp.sqrt(jnp.float32(fan_in))
        w_t = jax.random.uniform(kw, (fan_in, fan_out), jnp.float32,
                                 minval=-bound, maxval=bound)
        if bias:
            b = jax.random.uniform(kb, (1, fan_out), jnp.float32,
                                   minval=-bound, maxval=bound)
        else:
            b = jnp.zeros((1, fan_out), jnp.float32)
        params.append((w_t, b))
    return params


if __name__ == "__main__":
    key = jax.random.PRNGKey(0)
    key, kx = jax.random.split(key)

    # Small shapes consistent with the module: MLP(sizes=(32, 64, 16))
    sizes = (32, 64, 16)
    batch = 8
    x = jax.random.normal(kx, (batch, sizes[0]), jnp.float32)

    params = init_mlp_params(key, sizes, bias=True)

    # Pad/cast the weights ONCE (perf feedback: do not re-pad per forward call).
    prep = prepare_mlp_params(params)

    # force_pallas=True so the demo exercises the kernel even at tiny sizes.
    out = mlp_forward_pallas(x, prep, force_pallas=True)
    out = jax.block_until_ready(out)

    # Pure-JAX f32 reference (same math as the torch Linear/Tanh chain).
    ref = x
    for i, (w_t, b) in enumerate(params):
        ref = ref @ w_t + b
        if i < len(params) - 1:
            ref = jnp.tanh(ref)

    assert out.shape == (batch, sizes[-1])
    # Loose tolerance: MXU operands are bf16 and the hidden epilogue may run in
    # bf16 on v6e/v7x (accumulation + final bias-add stay f32).
    assert jnp.allclose(out, ref, atol=3e-2, rtol=3e-2), (
        float(jnp.max(jnp.abs(out - ref))))

    print("KERNEL_OK")
</pallas_src>

<mosaic_0001>
module attributes {stable_mosaic.version = 11 : i64} {
  func.func @_mlp_fused_kernel(%arg0: i32, %arg1: memref<8x128xbf16, #tpu.memory_space<vmem>>, %arg2: memref<128x128xbf16, #tpu.memory_space<vmem>>, %arg3: memref<1x128xbf16, #tpu.memory_space<vmem>>, %arg4: memref<128x128xbf16, #tpu.memory_space<vmem>>, %arg5: memref<1x128xf32, #tpu.memory_space<vmem>>, %arg6: memref<8x128xf32, #tpu.memory_space<vmem>>) attributes {dimension_semantics = [#tpu.dimension_semantics<parallel>], iteration_bounds = array<i64: 1>, scalar_prefetch = 0 : i64, scratch_operands = 0 : i64, tpu.core_type = #tpu.core_type<tc>, window_params = [{transform_indices = @transform_0, window_bounds = array<i64: 8, 128>}, {pipeline_mode = #tpu.pipeline_mode<synchronous>, transform_indices = @transform_1, window_bounds = array<i64: 128, 128>}, {pipeline_mode = #tpu.pipeline_mode<synchronous>, transform_indices = @transform_2, window_bounds = array<i64: 1, 128>}, {pipeline_mode = #tpu.pipeline_mode<synchronous>, transform_indices = @transform_3, window_bounds = array<i64: 128, 128>}, {pipeline_mode = #tpu.pipeline_mode<synchronous>, transform_indices = @transform_4, window_bounds = array<i64: 1, 128>}, {transform_indices = @transform_5, window_bounds = array<i64: 8, 128>}]} {
    %c0 = arith.constant 0 : index
    %c0_0 = arith.constant 0 : index
    %0 = vector.load %arg1[%c0, %c0_0] : memref<8x128xbf16, #tpu.memory_space<vmem>>, vector<8x128xbf16>
    %c0_1 = arith.constant 0 : index
    %c0_2 = arith.constant 0 : index
    %1 = vector.load %arg2[%c0_1, %c0_2] : memref<128x128xbf16, #tpu.memory_space<vmem>>, vector<128x128xbf16>
    %cst = arith.constant dense<0.000000e+00> : vector<8x128xf32>
    %2 = tpu.matmul %0, %1, %cst {dimension_numbers = #tpu.dot_dimension_numbers<[1], [0], [0], [1], [0, 0, 1, 1], [], []>} : vector<8x128xbf16>, vector<128x128xbf16>, vector<8x128xf32> -> vector<8x128xf32>
    %3 = arith.truncf %2 : vector<8x128xf32> to vector<8x128xbf16>
    %c0_3 = arith.constant 0 : index
    %c0_4 = arith.constant 0 : index
    %4 = vector.load %arg3[%c0_3, %c0_4] : memref<1x128xbf16, #tpu.memory_space<vmem>>, vector<1x128xbf16>
    %5 = vector.broadcast %4 : vector<1x128xbf16> to vector<8x128xbf16>
    %6 = arith.addf %3, %5 : vector<8x128xbf16>
    %7 = math.tanh %6 : vector<8x128xbf16>
    %c0_5 = arith.constant 0 : index
    %c0_6 = arith.constant 0 : index
    %8 = vector.load %arg4[%c0_5, %c0_6] : memref<128x128xbf16, #tpu.memory_space<vmem>>, vector<128x128xbf16>
    %cst_7 = arith.constant dense<0.000000e+00> : vector<8x128xf32>
    %9 = tpu.matmul %7, %8, %cst_7 {dimension_numbers = #tpu.dot_dimension_numbers<[1], [0], [0], [1], [0, 0, 1, 1], [], []>} : vector<8x128xbf16>, vector<128x128xbf16>, vector<8x128xf32> -> vector<8x128xf32>
    %c0_8 = arith.constant 0 : index
    %c0_9 = arith.constant 0 : index
    %10 = vector.load %arg5[%c0_8, %c0_9] : memref<1x128xf32, #tpu.memory_space<vmem>>, vector<1x128xf32>
    %11 = vector.broadcast %10 : vector<1x128xf32> to vector<8x128xf32>
    %12 = arith.addf %9, %11 : vector<8x128xf32>
    %c0_10 = arith.constant 0 : index
    %c0_11 = arith.constant 0 : index
    %13 = vector.load %arg6[%c0_10, %c0_11] : memref<8x128xf32, #tpu.memory_space<vmem>>, vector<8x128xf32>
    tpu.vector_store %arg6[%c0_10, %c0_11], %12 {strides = array<i32>} : memref<8x128xf32, #tpu.memory_space<vmem>>, vector<8x128xf32>,
    return
  }
  func.func @transform_0(%arg0: i32) -> (i32, i32) {
    %c0_i32 = arith.constant 0 : i32
    %c0_i32_0 = arith.constant 0 : i32
    return %arg0, %c0_i32 : i32, i32
  }
  func.func @transform_1(%arg0: i32) -> (i32, i32) {
    %c0_i32 = arith.constant 0 : i32
    %c0_i32_0 = arith.constant 0 : i32
    %c0_i32_1 = arith.constant 0 : i32
    return %c0_i32, %c0_i32_0 : i32, i32
  }
  func.func @transform_2(%arg0: i32) -> (i32, i32) {
    %c0_i32 = arith.constant 0 : i32
    %c0_i32_0 = arith.constant 0 : i32
    %c0_i32_1 = arith.constant 0 : i32
    return %c0_i32, %c0_i32_0 : i32, i32
  }
  func.func @transform_3(%arg0: i32) -> (i32, i32) {
    %c0_i32 = arith.constant 0 : i32
    %c0_i32_0 = arith.constant 0 : i32
    %c0_i32_1 = arith.constant 0 : i32
    return %c0_i32, %c0_i32_0 : i32, i32
  }
  func.func @transform_4(%arg0: i32) -> (i32, i32) {
    %c0_i32 = arith.constant 0 : i32
    %c0_i32_0 = arith.constant 0 : i32
    %c0_i32_1 = arith.constant 0 : i32
    return %c0_i32, %c0_i32_0 : i32, i32
  }
  func.func @transform_5(%arg0: i32) -> (i32, i32) {
    %c0_i32 = arith.constant 0 : i32
    %c0_i32_0 = arith.constant 0 : i32
    return %arg0, %c0_i32 : i32, i32
  }
}

module attributes {stable_mosaic.version = 11 : i64} {
  func.func @_mlp_fused_kernel(%arg0: i32, %arg1: memref<8x128xbf16, #tpu.memory_space<vmem>>, %arg2: memref<128x128xbf16, #tpu.memory_space<vmem>>, %arg3: memref<1x128xbf16, #tpu.memory_space<vmem>>, %arg4: memref<128x128xbf16, #tpu.memory_space<vmem>>, %arg5: memref<1x128xf32, #tpu.memory_space<vmem>>, %arg6: memref<8x128xf32, #tpu.memory_space<vmem>>) attributes {dimension_semantics = [#tpu.dimension_semantics<parallel>], iteration_bounds = array<i64: 1>, scalar_prefetch = 0 : i64, scratch_operands = 0 : i64, tpu.core_type = #tpu.core_type<tc>, window_params = [{transform_indices = @transform_0, window_bounds = array<i64: 8, 128>}, {pipeline_mode = #tpu.pipeline_mode<synchronous>, transform_indices = @transform_1, window_bounds = array<i64: 128, 128>}, {pipeline_mode = #tpu.pipeline_mode<synchronous>, transform_indices = @transform_2, window_bounds = array<i64: 1, 128>}, {pipeline_mode = #tpu.pipeline_mode<synchronous>, transform_indices = @transform_3, window_bounds = array<i64: 128, 128>}, {pipeline_mode = #tpu.pipeline_mode<synchronous>, transform_indices = @transform_4, window_bounds = array<i64: 1, 128>}, {transform_indices = @transform_5, window_bounds = array<i64: 8, 128>}]} {
    %c0 = arith.constant 0 : index
    %c0_0 = arith.constant 0 : index
    %0 = vector.load %arg1[%c0, %c0_0] : memref<8x128xbf16, #tpu.memory_space<vmem>>, vector<8x128xbf16>
    %c0_1 = arith.constant 0 : index
    %c0_2 = arith.constant 0 : index
    %1 = vector.load %arg2[%c0_1, %c0_2] : memref<128x128xbf16, #tpu.memory_space<vmem>>, vector<128x128xbf16>
    %cst = arith.constant dense<0.000000e+00> : vector<8x128xf32>
    %2 = tpu.matmul %0, %1, %cst {dimension_numbers = #tpu.dot_dimension_numbers<[1], [0], [0], [1], [0, 0, 1, 1], [], []>} : vector<8x128xbf16>, vector<128x128xbf16>, vector<8x128xf32> -> vector<8x128xf32>
    %3 = arith.truncf %2 : vector<8x128xf32> to vector<8x128xbf16>
    %c0_3 = arith.constant 0 : index
    %c0_4 = arith.constant 0 : index
    %4 = vector.load %arg3[%c0_3, %c0_4] : memref<1x128xbf16, #tpu.memory_space<vmem>>, vector<1x128xbf16>
    %5 = vector.broadcast %4 : vector<1x128xbf16> to vector<8x128xbf16>
    %6 = arith.addf %3, %5 : vector<8x128xbf16>
    %7 = math.tanh %6 : vector<8x128xbf16>
    %c0_5 = arith.constant 0 : index
    %c0_6 = arith.constant 0 : index
    %8 = vector.load %arg4[%c0_5, %c0_6] : memref<128x128xbf16, #tpu.memory_space<vmem>>, vector<128x128xbf16>
    %cst_7 = arith.constant dense<0.000000e+00> : vector<8x128xf32>
    %9 = tpu.matmul %7, %8, %cst_7 {dimension_numbers = #tpu.dot_dimension_numbers<[1], [0], [0], [1], [0, 0, 1, 1], [], []>} : vector<8x128xbf16>, vector<128x128xbf16>, vector<8x128xf32> -> vector<8x128xf32>
    %c0_8 = arith.constant 0 : index
    %c0_9 = arith.constant 0 : index
    %10 = vector.load %arg5[%c0_8, %c0_9] : memref<1x128xf32, #tpu.memory_space<vmem>>, vector<1x128xf32>
    %11 = vector.broadcast %10 : vector<1x128xf32> to vector<8x128xf32>
    %12 = arith.addf %9, %11 : vector<8x128xf32>
    %c0_10 = arith.constant 0 : index
    %c0_11 = arith.constant 0 : index
    %13 = vector.load %arg6[%c0_10, %c0_11] : memref<8x128xf32, #tpu.memory_space<vmem>>, vector<8x128xf32>
    tpu.vector_store %arg6[%c0_10, %c0_11], %12 {strides = array<i32>} : memref<8x128xf32, #tpu.memory_space<vmem>>, vector<8x128xf32>,
    return
  }
  func.func @transform_0(%arg0: i32) -> (i32, i32) {
    %c0_i32 = arith.constant 0 : i32
    %c0_i32_0 = arith.constant 0 : i32
    return %arg0, %c0_i32 : i32, i32
  }
  func.func @transform_1(%arg0: i32) -> (i32, i32) {
    %c0_i32 = arith.constant 0 : i32
    %c0_i32_0 = arith.constant 0 : i32
    %c0_i32_1 = arith.constant 0 : i32
    return %c0_i32, %c0_i32_0 : i32, i32
  }
  func.func @transform_2(%arg0: i32) -> (i32, i32) {
    %c0_i32 = arith.constant 0 : i32
    %c0_i32_0 = arith.constant 0 : i32
    %c0_i32_1 = arith.constant 0 : i32
    return %c0_i32, %c0_i32_0 : i32, i32
  }
  func.func @transform_3(%arg0: i32) -> (i32, i32) {
    %c0_i32 = arith.constant 0 : i32
    %c0_i32_0 = arith.constant 0 : i32
    %c0_i32_1 = arith.constant 0 : i32
    return %c0_i32, %c0_i32_0 : i32, i32
  }
  func.func @transform_4(%arg0: i32) -> (i32, i32) {
    %c0_i32 = arith.constant 0 : i32
    %c0_i32_0 = arith.constant 0 : i32
    %c0_i32_1 = arith.constant 0 : i32
    return %c0_i32, %c0_i32_0 : i32, i32
  }
  func.func @transform_5(%arg0: i32) -> (i32, i32) {
    %c0_i32 = arith.constant 0 : i32
    %c0_i32_0 = arith.constant 0 : i32
    return %arg0, %c0_i32 : i32, i32
  }
}

</mosaic_0001>

<bundles_post_ra>
// kernel: tpu_custom_call.1
= control target key start
LH: loop header
LB: loop body
LE: loop exit
PB: predicated region body
PF: predicated region fallthrough
CT: control target
= control target key end

     0   :  { %10 = vsyncpa [#allocation3], 0  ;;  %s502_s0 = inlined_call_operand.hbm [shape: bf16[8,128], index: 0, kind: input, shape index: {}]   ;;  %s503_s1 = inlined_call_operand.hbm [shape: bf16[128,128], index: 1, kind: input, shape index: {}]   ;;  %s504_s2 = inlined_call_operand.vmem [shape: bf16[1,128], index: 2, kind: input, shape index: {}]   ;;  %s505_s3 = inlined_call_operand.hbm [shape: bf16[128,128], index: 3, kind: input, shape index: {}]   ;;  %s506_s4 = inlined_call_operand.vmem [shape: f32[1,128], index: 4, kind: input, shape index: {}]   ;;  %s507_s5 = inlined_call_operand.hbm [shape: f32[8,128], index: 5, kind: output, shape index: {}]  }
   0x1   :  { %11 = vsyncpa [#allocation6], 0  ;;  %s28_s20 = sshll.u32 %s503_s1, 4  ;;  %s29_s20 = int_to_ptr.hbm [resolvable:$true] %s28_s20 }
   0x2   :  { %12 = vsyncpa [#allocation4], 0  ;;  %s448_s21 = smov [#allocation5]   ;;  %s18_s25 = sshll.u32 %s502_s0, 4  ;;  %s19_s25 = int_to_ptr.hbm [resolvable:$true] %s18_s25 }
   0x3   :  { %s30_s22 = sshll.u32 %s448_s21, 4  ;;  %s449_s26 = smov 64   ;;  %s31_s22 = int_to_ptr.vmem [resolvable:$true] %s30_s22 }
   0x4   :  { %s450_s27 = smov 4   ;;  %s451_s28 = smov [#allocation2]  }
   0x5   :  { %36 = dma.hbm_to_vmem [thread:$0]  %s29_s20, 1024, %s31_s22, [#allocation6], %s449_s26, %s449_s26, %s450_s27  }
   0x6   :  { %s20_s29 = sshll.u32 %s451_s28, 4  ;;  %s43_s7 = sshll.u32 %s505_s3, 4  ;;  %s21_s29 = int_to_ptr.vmem [resolvable:$true] %s20_s29  ;;  %s44_s7 = int_to_ptr.hbm [resolvable:$true] %s43_s7 }
   0x7   :  { %23 = dma.hbm_to_vmem [thread:$0]  %s19_s25, 64, %s21_s29, [#allocation3]  }
   0x8   :  { %s452_s1 = smov [#allocation7]  }
   0x9   :  { %s45_s8 = sshll.u32 %s452_s1, 4  ;;  %s46_s8 = int_to_ptr.vmem [resolvable:$true] %s45_s8 }
   0xa   :  { %51 = dma.hbm_to_vmem [thread:$0]  %s44_s7, 1024, %s46_s8, [#allocation6], %s449_s26, %s449_s26, %s450_s27  }
   0xb   :  { %442 = dma.done.wait [#allocation3], 64  }
   0xc   :  { %443 = vsyncadd [#allocation3], 4294967232 }
   0xd   :  { %444 = dma.done.wait [#allocation6], 2048  }
   0xe   :  { %445 = vsyncadd [#allocation6], 4294965248  ;;  %v328_v0 = vld [vmem:[#allocation5 + $0x38] sm:$0xff]  ;;  %v327_v1 = vld [vmem:[#allocation5 + $0x30] sm:$0xff]  ;;  %s453_s11 = smov [#allocation8]   ;;  %s246_s14 = sshll.u32 %s507_s5, 4  ;;  %s247_s14 = int_to_ptr.hbm [resolvable:$true] %s246_s14 }
   0xf   :  { %131 = vmatpush.bf16.msra.mxu0 %v328_v0  ;;  %v336_v2 = vld [vmem:[#allocation7 + $0x38] sm:$0xff]  ;;  %v335_v3 = vld [vmem:[#allocation7 + $0x30] sm:$0xff]  ;;  %v326_v4 = vld [vmem:[#allocation5 + $0x28] sm:$0xff] }
  0x10   :  { %225 = vmatpush.bf16.msra.mxu1 %v336_v2  ;;  %v334_v5 = vld [vmem:[#allocation7 + $0x28] sm:$0xff]  ;;  %v325_v6 = vld [vmem:[#allocation5 + $0x20] sm:$0xff]  ;;  %v324_v7 = vld [vmem:[#allocation5 + $0x18] sm:$0xff] }
  0x11   :  { %v323_v8 = vld [vmem:[#allocation5 + $0x10] sm:$0xff]  ;;  %v322_v9 = vld [vmem:[#allocation5 + $0x8] sm:$0xff]  ;;  %v321_v10 = vld [vmem:[#allocation5] sm:$0xff] }
  0x12   :  { %v66_v11 = vld [vmem:[#allocation2] sm:$0xf]  ;;  %v333_v12 = vld [vmem:[#allocation7 + $0x20] sm:$0xff]  ;;  %v331_v14 = vld [vmem:[#allocation7 + $0x10] sm:$0xff] }
  0x13   :  { %132 = vmatpush.bf16.msra.mxu0 %v327_v1  ;;  %v332_v13 = vld [vmem:[#allocation7 + $0x18] sm:$0xff]  ;;  %v330_v15 = vld [vmem:[#allocation7 + $0x8] sm:$0xff]  ;;  %v329_v16 = vld [vmem:[#allocation7] sm:$0xff] }
  0x14   :  { %226 = vmatpush.bf16.msra.mxu1 %v335_v3  ;;  %v145_v17 = vld [vmem:[%s504_s2] sm:$0x1]  ;;  %s244_s2 = sshll.u32 %s453_s11, 4  ;;  %s245_s2 = int_to_ptr.vmem [resolvable:$true] %s244_s2 }
  0x15   :  { %v147_v18 = vpack.i.b16 %v145_v17, %v145_v17  ;;  %v343_v30 = vld [vmem:[%s506_s4] ss:$0 sm:$0xff] }
  0x17   :  { %133 = vmatpush.bf16.msra.mxu0 %v326_v4  ;;  %v149_v19 = vperm.slane %v147_v18, 0 }
  0x18   :  { %227 = vmatpush.bf16.msra.mxu1 %v334_v5 }
  0x19   :  { %v151_v22 = vunpack.c.l.bf16 %v149_v19 }
  0x1b   :  { %134 = vmatpush.bf16.msra.mxu0 %v325_v6 }
  0x1c   :  { %228 = vmatpush.bf16.msra.mxu1 %v333_v12 }
  0x1f   :  { %135 = vmatpush.bf16.msra.mxu0 %v324_v7 }
  0x20   :  { %229 = vmatpush.bf16.msra.mxu1 %v332_v13 }
  0x23   :  { %136 = vmatpush.bf16.msra.mxu0 %v323_v8 }
  0x24   :  { %230 = vmatpush.bf16.msra.mxu1 %v331_v14 }
  0x27   :  { %137 = vmatpush.bf16.msra.mxu0 %v322_v9 }
  0x28   :  { %231 = vmatpush.bf16.msra.mxu1 %v330_v15 }
  0x2b   :  { %138 = vmatpush.bf16.msra.mxu0 %v321_v10 }
  0x2c   :  { %232 = vmatpush.bf16.msra.mxu1 %v329_v16 }
  0x2e   :  { %139 = vmatmul.bf16.vlgmr.msra.gmra.mxu0 %v66_v11 }
  0xab   :  { %v140_v20 = vpop.f32.mrf.mxu0 }
  0xac   :  { %v144_v21 = vpack.c.bf16 %v140_v20, %v140_v20 }
  0xae   :  { %v150_v23 = vunpack.c.l.bf16 %v144_v21 }
  0xb0   :  { %v152_v24 = vadd.f32 %v151_v22, %v150_v23 }
  0xb2   :  { %v153_v25 = vpack.c.bf16 %v152_v24, %v152_v24 }
  0xb3   :  { %v142_v26 = vpop.f32.mrf.mxu0 }
  0xb4   :  { %v154_v27 = vunpack.c.l.bf16 %v153_v25 }
  0xb6   :  { %344 = vtanh.f32 %v154_v27 }
  0xbc   :  { %v345_v28 = vpop.eup %344 }
  0xbd   :  { %v156_v29 = vpack.c.bf16 %v345_v28, %v345_v28 }
  0xbf   :  { %233 = vmatmul.bf16.vlgmr.msra.gmra.mxu1 %v156_v29 }
 0x13c   :  { %v234_v31 = vpop.f32.mrf.mxu1 }
 0x13d   :  { %v235_v32 = vadd.f32 %v343_v30, %v234_v31 }
 0x13f   :  { %238 = vst [vmem:[#allocation8] sm:$0xff] %v235_v32 }
 0x140   :  { %249 = dma.vmem_to_hbm [thread:$0]  %s245_s2, 128, %s247_s14, [#allocation4]  }
 0x144   :  { %v236_v33 = vpop.f32.mrf.mxu1 }
 0x145   :  { %446 = dma.done.wait [#allocation4], 128  }
 0x146   :  { %447 = vsyncadd [#allocation4], 4294967168 }
 0x147   :  { %254 = vsyncpa [#allocation3], 1 }
 0x148   :  { %255 = vsyncpa [#allocation6], 1 }
 0x149   :  { %256 = vsyncpa [#allocation4], 1 }

// kernel: tpu_custom_call.1
= control target key start
LH: loop header
LB: loop body
LE: loop exit
PB: predicated region body
PF: predicated region fallthrough
CT: control target
= control target key end

     0   :  { %10 = vsyncpa [#allocation3], 0  ;;  %s502_s0 = inlined_call_operand.hbm [shape: bf16[8,128], index: 0, kind: input, shape index: {}]   ;;  %s503_s1 = inlined_call_operand.hbm [shape: bf16[128,128], index: 1, kind: input, shape index: {}]   ;;  %s504_s2 = inlined_call_operand.vmem [shape: bf16[1,128], index: 2, kind: input, shape index: {}]   ;;  %s505_s3 = inlined_call_operand.hbm [shape: bf16[128,128], index: 3, kind: input, shape index: {}]   ;;  %s506_s4 = inlined_call_operand.vmem [shape: f32[1,128], index: 4, kind: input, shape index: {}]   ;;  %s507_s5 = inlined_call_operand.hbm [shape: f32[8,128], index: 5, kind: output, shape index: {}]  }
   0x1   :  { %11 = vsyncpa [#allocation6], 0  ;;  %s28_s20 = sshll.u32 %s503_s1, 4  ;;  %s29_s20 = int_to_ptr.hbm [resolvable:$true] %s28_s20 }
   0x2   :  { %12 = vsyncpa [#allocation4], 0  ;;  %s448_s21 = smov [#allocation5]   ;;  %s18_s25 = sshll.u32 %s502_s0, 4  ;;  %s19_s25 = int_to_ptr.hbm [resolvable:$true] %s18_s25 }
   0x3   :  { %s30_s22 = sshll.u32 %s448_s21, 4  ;;  %s449_s26 = smov 64   ;;  %s31_s22 = int_to_ptr.vmem [resolvable:$true] %s30_s22 }
   0x4   :  { %s450_s27 = smov 4   ;;  %s451_s28 = smov [#allocation2]  }
   0x5   :  { %36 = dma.hbm_to_vmem [thread:$0]  %s29_s20, 1024, %s31_s22, [#allocation6], %s449_s26, %s449_s26, %s450_s27  }
   0x6   :  { %s20_s29 = sshll.u32 %s451_s28, 4  ;;  %s43_s7 = sshll.u32 %s505_s3, 4  ;;  %s21_s29 = int_to_ptr.vmem [resolvable:$true] %s20_s29  ;;  %s44_s7 = int_to_ptr.hbm [resolvable:$true] %s43_s7 }
   0x7   :  { %23 = dma.hbm_to_vmem [thread:$0]  %s19_s25, 64, %s21_s29, [#allocation3]  }
   0x8   :  { %s452_s1 = smov [#allocation7]  }
   0x9   :  { %s45_s8 = sshll.u32 %s452_s1, 4  ;;  %s46_s8 = int_to_ptr.vmem [resolvable:$true] %s45_s8 }
   0xa   :  { %51 = dma.hbm_to_vmem [thread:$0]  %s44_s7, 1024, %s46_s8, [#allocation6], %s449_s26, %s449_s26, %s450_s27  }
   0xb   :  { %442 = dma.done.wait [#allocation3], 64  }
   0xc   :  { %443 = vsyncadd [#allocation3], 4294967232 }
   0xd   :  { %444 = dma.done.wait [#allocation6], 2048  }
   0xe   :  { %445 = vsyncadd [#allocation6], 4294965248  ;;  %v328_v0 = vld [vmem:[#allocation5 + $0x38] sm:$0xff]  ;;  %v327_v1 = vld [vmem:[#allocation5 + $0x30] sm:$0xff]  ;;  %s453_s11 = smov [#allocation8]   ;;  %s246_s14 = sshll.u32 %s507_s5, 4  ;;  %s247_s14 = int_to_ptr.hbm [resolvable:$true] %s246_s14 }
   0xf   :  { %131 = vmatpush.bf16.msra.mxu0 %v328_v0  ;;  %v336_v2 = vld [vmem:[#allocation7 + $0x38] sm:$0xff]  ;;  %v335_v3 = vld [vmem:[#allocation7 + $0x30] sm:$0xff]  ;;  %v326_v4 = vld [vmem:[#allocation5 + $0x28] sm:$0xff] }
  0x10   :  { %225 = vmatpush.bf16.msra.mxu1 %v336_v2  ;;  %v334_v5 = vld [vmem:[#allocation7 + $0x28] sm:$0xff]  ;;  %v325_v6 = vld [vmem:[#allocation5 + $0x20] sm:$0xff]  ;;  %v324_v7 = vld [vmem:[#allocation5 + $0x18] sm:$0xff] }
  0x11   :  { %v323_v8 = vld [vmem:[#allocation5 + $0x10] sm:$0xff]  ;;  %v322_v9 = vld [vmem:[#allocation5 + $0x8] sm:$0xff]  ;;  %v321_v10 = vld [vmem:[#allocation5] sm:$0xff] }
  0x12   :  { %v66_v11 = vld [vmem:[#allocation2] sm:$0xf]  ;;  %v333_v12 = vld [vmem:[#allocation7 + $0x20] sm:$0xff]  ;;  %v331_v14 = vld [vmem:[#allocation7 + $0x10] sm:$0xff] }
  0x13   :  { %132 = vmatpush.bf16.msra.mxu0 %v327_v1  ;;  %v332_v13 = vld [vmem:[#allocation7 + $0x18] sm:$0xff]  ;;  %v330_v15 = vld [vmem:[#allocation7 + $0x8] sm:$0xff]  ;;  %v329_v16 = vld [vmem:[#allocation7] sm:$0xff] }
  0x14   :  { %226 = vmatpush.bf16.msra.mxu1 %v335_v3  ;;  %v145_v17 = vld [vmem:[%s504_s2] sm:$0x1]  ;;  %s244_s2 = sshll.u32 %s453_s11, 4  ;;  %s245_s2 = int_to_ptr.vmem [resolvable:$true] %s244_s2 }
  0x15   :  { %v147_v18 = vpack.i.b16 %v145_v17, %v145_v17  ;;  %v343_v30 = vld [vmem:[%s506_s4] ss:$0 sm:$0xff] }
  0x17   :  { %133 = vmatpush.bf16.msra.mxu0 %v326_v4  ;;  %v149_v19 = vperm.slane %v147_v18, 0 }
  0x18   :  { %227 = vmatpush.bf16.msra.mxu1 %v334_v5 }
  0x19   :  { %v151_v22 = vunpack.c.l.bf16 %v149_v19 }
  0x1b   :  { %134 = vmatpush.bf16.msra.mxu0 %v325_v6 }
  0x1c   :  { %228 = vmatpush.bf16.msra.mxu1 %v333_v12 }
  0x1f   :  { %135 = vmatpush.bf16.msra.mxu0 %v324_v7 }
  0x20   :  { %229 = vmatpush.bf16.msra.mxu1 %v332_v13 }
  0x23   :  { %136 = vmatpush.bf16.msra.mxu0 %v323_v8 }
  0x24   :  { %230 = vmatpush.bf16.msra.mxu1 %v331_v14 }
  0x27   :  { %137 = vmatpush.bf16.msra.mxu0 %v322_v9 }
  0x28   :  { %231 = vmatpush.bf16.msra.mxu1 %v330_v15 }
  0x2b   :  { %138 = vmatpush.bf16.msra.mxu0 %v321_v10 }
  0x2c   :  { %232 = vmatpush.bf16.msra.mxu1 %v329_v16 }
  0x2e   :  { %139 = vmatmul.bf16.vlgmr.msra.gmra.mxu0 %v66_v11 }
  0xab   :  { %v140_v20 = vpop.f32.mrf.mxu0 }
  0xac   :  { %v144_v21 = vpack.c.bf16 %v140_v20, %v140_v20 }
  0xae   :  { %v150_v23 = vunpack.c.l.bf16 %v144_v21 }
  0xb0   :  { %v152_v24 = vadd.f32 %v151_v22, %v150_v23 }
  0xb2   :  { %v153_v25 = vpack.c.bf16 %v152_v24, %v152_v24 }
  0xb3   :  { %v142_v26 = vpop.f32.mrf.mxu0 }
  0xb4   :  { %v154_v27 = vunpack.c.l.bf16 %v153_v25 }
  0xb6   :  { %344 = vtanh.f32 %v154_v27 }
  0xbc   :  { %v345_v28 = vpop.eup %344 }
  0xbd   :  { %v156_v29 = vpack.c.bf16 %v345_v28, %v345_v28 }
  0xbf   :  { %233 = vmatmul.bf16.vlgmr.msra.gmra.mxu1 %v156_v29 }
 0x13c   :  { %v234_v31 = vpop.f32.mrf.mxu1 }
 0x13d   :  { %v235_v32 = vadd.f32 %v343_v30, %v234_v31 }
 0x13f   :  { %238 = vst [vmem:[#allocation8] sm:$0xff] %v235_v32 }
 0x140   :  { %249 = dma.vmem_to_hbm [thread:$0]  %s245_s2, 128, %s247_s14, [#allocation4]  }
 0x144   :  { %v236_v33 = vpop.f32.mrf.mxu1 }
 0x145   :  { %446 = dma.done.wait [#allocation4], 128  }
 0x146   :  { %447 = vsyncadd [#allocation4], 4294967168 }
 0x147   :  { %254 = vsyncpa [#allocation3], 1 }
 0x148   :  { %255 = vsyncpa [#allocation6], 1 }
 0x149   :  { %256 = vsyncpa [#allocation4], 1 }

</bundles_post_ra>
